<compile_context>
chip_gen: v5e
topology: v5e:2x2
jax: 0.10.0
libtpu: 0.0.40
codegen_flags: <defaults>
</compile_context>

<pallas_src>
import functools

import jax
import jax.numpy as jnp
from jax.experimental import pallas as pl
from jax.experimental.pallas import tpu as pltpu


def _round_up(a, b):
    return -(-a // b) * b


def _vmem_capacity_bytes(default=64 << 20):
    """Physical VMEM bytes for the current chip (conservative v7x default)."""
    try:
        info = pltpu.get_tpu_info()
    except Exception:
        return default
    for name in ("vmem_capacity_bytes", "vmem_bytes", "vmem_size_bytes"):
        v = getattr(info, name, None)
        if v:
            return int(v)
    return default


def _hinge_block_kernel(x_ref, t_ref, o_ref, *, margin, block_rows, block_cols,
                        valid_rows, valid_cols, needs_row_mask, needs_col_mask):
    """One grid step: hinge over a (block_rows, block_cols) tile, VALU-reduced
    to an (8, block_cols) f32 partial written to this step's output block."""
    i = pl.program_id(0)
    j = pl.program_id(1)

    x = x_ref[...].astype(jnp.float32)
    t = t_ref[...].astype(jnp.float32)
    hinge = jnp.maximum(margin - x * t, 0.0)          # pure VPU elementwise

    def partial_sum(h):
        # (block_rows, cols) -> (block_rows//8, 8, cols) -> sum leading axis:
        # whole-vreg adds only (no XLU); last dim / sublane grouping preserved.
        return jnp.sum(h.reshape(block_rows // 8, 8, block_cols), axis=0)

    tail_conds = []
    if needs_row_mask:
        tail_conds.append(i == pl.num_programs(0) - 1)
    if needs_col_mask:
        tail_conds.append(j == pl.num_programs(1) - 1)

    if not tail_conds:
        # Exactly divisible: no masking anywhere.
        o_ref[...] = partial_sum(hinge)
        return

    is_tail = tail_conds[0]
    for c in tail_conds[1:]:
        is_tail = jnp.logical_or(is_tail, c)

    @pl.when(jnp.logical_not(is_tail))
    def _():
        # Fast path: interior blocks never pay iota/compare/select.
        o_ref[...] = partial_sum(hinge)

    @pl.when(is_tail)
    def _():
        # Tail block(s): zero out-of-bounds rows/cols (jnp.where selects, so
        # even NaN/Inf garbage in the OOB region is discarded).
        h = hinge
        if needs_row_mask:
            row = jax.lax.broadcasted_iota(jnp.int32, h.shape, 0) + i * block_rows
            h = jnp.where(row < valid_rows, h, 0.0)
        if needs_col_mask:
            col = jax.lax.broadcasted_iota(jnp.int32, h.shape, 1) + j * block_cols
            h = jnp.where(col < valid_cols, h, 0.0)
        o_ref[...] = partial_sum(h)


def hinge_loss(x, t, *, margin=1.0, target_block_bytes=None):
    """mean(max(0, margin - x * t)), matching HingeLoss.forward.

    NOTE: keep x and t in bf16 at this boundary if the producer already has
    bf16 activations -- the kernel upcasts internally and the loss is
    HBM-bandwidth bound, so streaming bf16 is ~2x faster end to end.
    """
    assert x.shape == t.shape
    # Flatten to 2D (rows, cols); merging leading dims is layout-free.
    if x.ndim != 2:
        cols_ = x.shape[-1] if x.ndim >= 1 else 1
        x = x.reshape(-1, cols_)
        t = t.reshape(-1, cols_)
    rows, cols = x.shape
    inv_n = 1.0 / float(rows * cols)

    vmem_cap = _vmem_capacity_bytes()
    if target_block_bytes is None:
        # ~1/10 of physical VMEM per f32 input tile: ~6.4 MiB on v7x (64 MiB),
        # ~12.8 MiB on v5e/v6e (128 MiB).
        target_block_bytes = max(2 << 20, min(vmem_cap // 10, 16 << 20))

    lane_cols = _round_up(cols, 128)
    if 8 * lane_cols * 4 > target_block_bytes:
        # Very wide rows: tile the column dimension too (multiple of 128).
        block_rows = 8
        block_cols = max(128, (target_block_bytes // (8 * 4)) // 128 * 128)
        block_cols = int(min(block_cols, lane_cols))
    else:
        block_cols = cols                       # full width
        rows8 = _round_up(rows, 8)
        target_rows = max(8, (target_block_bytes // (lane_cols * 4)) // 8 * 8)
        block_rows = int(min(target_rows, rows8))

    row_blocks = pl.cdiv(rows, block_rows)
    col_blocks = pl.cdiv(cols, block_cols)
    needs_row_mask = (rows % block_rows) != 0
    needs_col_mask = (cols % block_cols) != 0

    # Resident VMEM estimate (lane-padded cols): 2 inputs x 2 pipeline buffers
    # + f32 hinge temp + double-buffered (8, block_cols) partial outputs.
    lane_bc = _round_up(block_cols, 128)
    in_tile = block_rows * lane_bc * x.dtype.itemsize
    f32_tile = block_rows * lane_bc * 4
    out_tile = 8 * lane_bc * 4
    est_vmem = 4 * in_tile + f32_tile + 2 * out_tile + (2 << 20)
    vmem_limit = None
    if est_vmem > (32 << 20):
        vmem_limit = int(min(est_vmem, int(vmem_cap * 0.9)))

    kernel = functools.partial(
        _hinge_block_kernel,
        margin=float(margin),
        block_rows=block_rows,
        block_cols=block_cols,
        valid_rows=rows,
        valid_cols=cols,
        needs_row_mask=needs_row_mask,
        needs_col_mask=needs_col_mask,
    )

    partials = pl.pallas_call(
        kernel,
        out_shape=jax.ShapeDtypeStruct(
            (row_blocks, col_blocks, 8, block_cols), jnp.float32),
        grid_spec=pltpu.PrefetchScalarGridSpec(
            num_scalar_prefetch=0,
            grid=(row_blocks, col_blocks),
            in_specs=[
                pl.BlockSpec((block_rows, block_cols), lambda i, j: (i, j)),
                pl.BlockSpec((block_rows, block_cols), lambda i, j: (i, j)),
            ],
            out_specs=pl.BlockSpec((None, None, 8, block_cols),
                                   lambda i, j: (i, j, 0, 0)),
        ),
        compiler_params=pltpu.CompilerParams(
            dimension_semantics=("parallel", "parallel"),
            vmem_limit_bytes=vmem_limit,
        ),
    )(x, t)

    # Tiny partials array; final reduce + mean scale in plain XLA.
    return jnp.sum(partials) * inv_n


if __name__ == "__main__":
    key = jax.random.PRNGKey(0)
    k1, k2, k3, k4, k5, k6 = jax.random.split(key, 6)

    # Case 1: (batch=16, features=128) f32 logits; +/-1 targets. Exact tiling.
    x = jax.random.normal(k1, (16, 128), dtype=jnp.float32)
    t = jnp.where(jax.random.normal(k2, (16, 128)) > 0.0, 1.0, -1.0).astype(
        jnp.float32)
    loss = jax.block_until_ready(hinge_loss(x, t))
    ref = jnp.mean(jnp.maximum(1.0 - x * t, 0.0))
    assert jnp.allclose(loss, ref, rtol=1e-5, atol=1e-6), (loss, ref)

    # Case 2: ragged (19, 200) exercises the row-tail mask (no wrapper pad).
    x2 = jax.random.normal(k3, (19, 200), dtype=jnp.float32)
    t2 = jnp.where(jax.random.normal(k4, (19, 200)) > 0.0, 1.0, -1.0).astype(
        jnp.float32)
    loss2 = jax.block_until_ready(hinge_loss(x2, t2))
    ref2 = jnp.mean(jnp.maximum(1.0 - x2 * t2, 0.0))
    assert jnp.allclose(loss2, ref2, rtol=1e-5, atol=1e-6), (loss2, ref2)

    # Case 3: force the column-tiling guard path (tiny tile budget) with a
    # ragged column tail (640 % 256 != 0).
    x3 = jax.random.normal(k5, (24, 640), dtype=jnp.float32)
    t3 = jnp.where(jax.random.normal(k6, (24, 640)) > 0.0, 1.0, -1.0).astype(
        jnp.float32)
    loss3 = jax.block_until_ready(hinge_loss(x3, t3, target_block_bytes=8192))
    ref3 = jnp.mean(jnp.maximum(1.0 - x3 * t3, 0.0))
    assert jnp.allclose(loss3, ref3, rtol=1e-5, atol=1e-6), (loss3, ref3)

    # Case 4: bf16 at the boundary (kernel upcasts internally).
    xb = x.astype(jnp.bfloat16)
    tb = t.astype(jnp.bfloat16)
    loss4 = jax.block_until_ready(hinge_loss(xb, tb))
    ref4 = jnp.mean(jnp.maximum(
        1.0 - xb.astype(jnp.float32) * tb.astype(jnp.float32), 0.0))
    assert jnp.allclose(loss4, ref4, rtol=2e-3, atol=2e-3), (loss4, ref4)

    print("KERNEL_OK")
</pallas_src>

<mosaic_0001>
module attributes {stable_mosaic.version = 11 : i64} {
  func.func @_hinge_block_kernel(%arg0: i32, %arg1: i32, %arg2: memref<16x128xf32, #tpu.memory_space<vmem>>, %arg3: memref<16x128xf32, #tpu.memory_space<vmem>>, %arg4: memref<1x1x8x128xf32, #tpu.memory_space<vmem>>) attributes {dimension_semantics = [#tpu.dimension_semantics<parallel>, #tpu.dimension_semantics<parallel>], iteration_bounds = array<i64: 1, 1>, scalar_prefetch = 0 : i64, scratch_operands = 0 : i64, tpu.core_type = #tpu.core_type<tc>, window_params = [{transform_indices = @transform_0, window_bounds = array<i64: 16, 128>}, {transform_indices = @transform_1, window_bounds = array<i64: 16, 128>}, {transform_indices = @transform_2, window_bounds = array<i64: 1, 1, 8, 128>}]} {
    %c0 = arith.constant 0 : index
    %c0_0 = arith.constant 0 : index
    %0 = vector.load %arg2[%c0, %c0_0] : memref<16x128xf32, #tpu.memory_space<vmem>>, vector<16x128xf32>
    %c0_1 = arith.constant 0 : index
    %c0_2 = arith.constant 0 : index
    %1 = vector.load %arg3[%c0_1, %c0_2] : memref<16x128xf32, #tpu.memory_space<vmem>>, vector<16x128xf32>
    %2 = arith.mulf %0, %1 : vector<16x128xf32>
    %cst = arith.constant 1.000000e+00 : f32
    %3 = vector.broadcast %cst : f32 to vector<16x128xf32>
    %4 = arith.subf %3, %2 : vector<16x128xf32>
    %cst_3 = arith.constant 0.000000e+00 : f32
    %5 = vector.broadcast %cst_3 : f32 to vector<16x128xf32>
    %6 = arith.maximumf %4, %5 : vector<16x128xf32>
    %7 = vector.shape_cast %6 : vector<16x128xf32> to vector<2x8x128xf32>
    %cst_4 = arith.constant dense<0.000000e+00> : vector<8x128xf32>
    %8 = vector.multi_reduction <add>, %7, %cst_4 [0] : vector<2x8x128xf32> to vector<8x128xf32>
    %c0_5 = arith.constant 0 : index
    %c0_6 = arith.constant 0 : index
    %c0_7 = arith.constant 0 : index
    %c0_8 = arith.constant 0 : index
    %9 = vector.load %arg4[%c0_5, %c0_6, %c0_7, %c0_8] : memref<1x1x8x128xf32, #tpu.memory_space<vmem>>, vector<1x1x8x128xf32>
    %10 = vector.shape_cast %9 : vector<1x1x8x128xf32> to vector<8x128xf32>
    %11 = vector.shape_cast %8 : vector<8x128xf32> to vector<1x1x8x128xf32>
    tpu.vector_store %arg4[%c0_5, %c0_6, %c0_7, %c0_8], %11 {strides = array<i32>} : memref<1x1x8x128xf32, #tpu.memory_space<vmem>>, vector<1x1x8x128xf32>,
    return
  }
  func.func @transform_0(%arg0: i32, %arg1: i32) -> (i32, i32) {
    %c0_i32 = arith.constant 0 : i32
    return %arg0, %arg1 : i32, i32
  }
  func.func @transform_1(%arg0: i32, %arg1: i32) -> (i32, i32) {
    %c0_i32 = arith.constant 0 : i32
    return %arg0, %arg1 : i32, i32
  }
  func.func @transform_2(%arg0: i32, %arg1: i32) -> (i32, i32, i32, i32) {
    %c0_i32 = arith.constant 0 : i32
    %c0_i32_0 = arith.constant 0 : i32
    %c0_i32_1 = arith.constant 0 : i32
    return %arg0, %arg1, %c0_i32, %c0_i32_0 : i32, i32, i32, i32
  }
}

</mosaic_0001>

<bundles_post_ra>
// kernel: tpu_custom_call.1
= control target key start
LH: loop header
LB: loop body
LE: loop exit
PB: predicated region body
PF: predicated region fallthrough
CT: control target
= control target key end

     0   :  { %7 = vsyncpa [#allocation3], 0  ;;  %s186_s0 = inlined_call_operand.hbm [shape: f32[16,128], index: 0, kind: input, shape index: {}]   ;;  %s187_s1 = inlined_call_operand.hbm [shape: f32[16,128], index: 1, kind: input, shape index: {}]   ;;  %s188_s2 = inlined_call_operand.hbm [shape: f32[1,1,8,128], index: 2, kind: output, shape index: {}]  }
   0x1   :  { %8 = vsyncpa [#allocation6], 0 }
   0x2   :  { %9 = vsyncpa [#allocation4], 0  ;;  %s14_s11 = sshll.u32 %s186_s0, 4  ;;  %s157_s12 = smov [#allocation2]   ;;  %s15_s11 = int_to_ptr.hbm [resolvable:$true] %s14_s11 }
   0x3   :  { %s16_s13 = sshll.u32 %s157_s12, 4  ;;  %s27_s16 = sshll.u32 %s187_s1, 4  ;;  %s17_s13 = int_to_ptr.vmem [resolvable:$true] %s16_s13  ;;  %s28_s16 = int_to_ptr.hbm [resolvable:$true] %s27_s16 }
   0x4   :  { %s158_s17 = smov 128   ;;  %s159_s18 = smov 8  }
   0x5   :  { %22 = dma.hbm_to_vmem [thread:$0]  %s15_s11, 256, %s17_s13, [#allocation3], %s158_s17, %s158_s17, %s159_s18  }
   0x6   :  { %s160_s19 = smov [#allocation5]  }
   0x7   :  { %s29_s20 = sshll.u32 %s160_s19, 4  ;;  %s30_s20 = int_to_ptr.vmem [resolvable:$true] %s29_s20 }
   0x8   :  { %35 = dma.hbm_to_vmem [thread:$0]  %s28_s16, 256, %s30_s20, [#allocation6], %s158_s17, %s158_s17, %s159_s18  }
   0x9   :  { %151 = dma.done.wait [#allocation3], 256  }
   0xa   :  { %152 = vsyncadd [#allocation3], 4294967040 }
   0xb   :  { %153 = dma.done.wait [#allocation6], 256  }
   0xc   :  { %154 = vsyncadd [#allocation6], 4294967040  ;;  %v44_v0 = vld [vmem:[#allocation2] sm:$0xff]  ;;  %v45_v1 = vld [vmem:[#allocation2 + $0x8] sm:$0xff]  ;;  %s161_s0 = smov [#allocation7]   ;;  %s63_s23 = sshll.u32 %s188_s2, 4  ;;  %s64_s23 = int_to_ptr.hbm [resolvable:$true] %s63_s23 }
   0xd   :  { %v46_v2 = vld [vmem:[#allocation5] sm:$0xff]  ;;  %v47_v3 = vld [vmem:[#allocation5 + $0x8] sm:$0xff]  ;;  %s61_s1 = sshll.u32 %s161_s0, 4  ;;  %s62_s1 = int_to_ptr.vmem [resolvable:$true] %s61_s1 }
   0xe   :  { %v48_v4 = vmul.f32 %v46_v2, %v44_v0  ;;  %v49_v5 = vmul.f32 %v47_v3, %v45_v1 }
  0x10   :  { %v50_v6 = vsub.f32 1.0, %v48_v4  ;;  %v51_v7 = vsub.f32 1.0, %v49_v5 }
  0x12   :  { %v52_v8 = vmax.f32 %v50_v6, 0.0  ;;  %v53_v9 = vmax.f32 %v51_v7, 0.0 }
  0x14   :  { %v54_v10 = vadd.f32 %v53_v9, %v52_v8 }
  0x16   :  { %55 = vst [vmem:[#allocation7] sm:$0xff] %v54_v10 }
  0x17   :  { %66 = dma.vmem_to_hbm [thread:$0]  %s62_s1, 128, %s64_s23, [#allocation4]  }
  0x18   :  { %155 = dma.done.wait [#allocation4], 128  }
  0x19   :  { %156 = vsyncadd [#allocation4], 4294967168 }
  0x1a   :  { %71 = vsyncpa [#allocation3], 1 }
  0x1b   :  { %72 = vsyncpa [#allocation6], 1 }
  0x1c   :  { %73 = vsyncpa [#allocation4], 1 }

</bundles_post_ra>
